<compile_context>
chip_gen: v7x
topology: tpu7x:2x2x1
jax: 0.10.0
libtpu: 0.0.40
codegen_flags: <defaults>
</compile_context>

<pallas_src>
import math

import jax
import jax.numpy as jnp
from jax.experimental import pallas as pl
from jax.experimental.pallas import tpu as pltpu

LANE = 128


def _round_up(x, m):
    return (x + m - 1) // m * m


# ---------------------------------------------------------------------------
# One-time feature probe: does this JAX accept pipeline_mode=pl.Buffered(1)?
# (tiny 8x128 copy kernel, lowered+compiled once per process; result cached)
# ---------------------------------------------------------------------------
_BUFFERED_OK = None


def _buffered_weights_supported():
    global _BUFFERED_OK
    if _BUFFERED_OK is None:
        try:
            spec = pl.BlockSpec((8, LANE), lambda i: (0, 0),
                                pipeline_mode=pl.Buffered(1))

            def _probe(a_ref, o_ref):
                o_ref[...] = a_ref[...]

            fn = pl.pallas_call(
                _probe,
                out_shape=jax.ShapeDtypeStruct((8, LANE), jnp.float32),
                grid=(1,),
                in_specs=[spec],
                out_specs=pl.BlockSpec((8, LANE), lambda i: (0, 0)),
            )
            jax.jit(fn).lower(jnp.zeros((8, LANE), jnp.float32)).compile()
            _BUFFERED_OK = True
        except Exception:
            _BUFFERED_OK = False
    return _BUFFERED_OK


# ---------------------------------------------------------------------------
# One-time parameter preprocessing (hoisted out of the forward path).
# ---------------------------------------------------------------------------
def prepare_params(params, lane=LANE):
    """Torch-style (out, in) Linear params -> padded (in, out) bf16 weights + one
    packed f32 bias block. Zero padding is exact through bias-add/ReLU: padded
    input lanes and padded bias lanes are 0, so padded activations stay 0."""
    dims = [params[0][0].shape[1]] + [w.shape[0] for (w, _) in params]
    pad_dims = [_round_up(di, lane) for di in dims]

    weights = []
    for i, (w, _) in enumerate(params):
        fan_out, fan_in = w.shape
        wt = jnp.zeros((pad_dims[i], pad_dims[i + 1]), jnp.bfloat16)
        wt = wt.at[:fan_in, :fan_out].set(jnp.asarray(w).T.astype(jnp.bfloat16))
        weights.append(wt)

    max_np = max(pad_dims[1:])
    b_rows = _round_up(max(len(params), 8), 8)
    b_packed = jnp.zeros((b_rows, max_np), jnp.float32)
    for i, (_, b) in enumerate(params):
        b_packed = b_packed.at[i, :dims[i + 1]].set(jnp.asarray(b).astype(jnp.float32))

    return {
        "weights": tuple(weights),
        "bias_packed": b_packed,
        "dims": tuple(dims),
        "pad_dims": tuple(pad_dims),
    }


# ---------------------------------------------------------------------------
# Kernel: one row-tile through the whole 6-layer MLP.
# ---------------------------------------------------------------------------
def _make_kernel(pad_dims):
    n_layers = len(pad_dims) - 1

    def kernel(x_ref, *refs):
        # refs = [w0..w5, bias_packed, out]
        b_ref = refs[n_layers]
        o_ref = refs[n_layers + 1]

        h = x_ref[...].astype(jnp.bfloat16)          # f32 -> bf16 (VPU, hidden under MXU)
        for i in range(n_layers):
            w_ref = refs[i]                          # (Kp, Np) bf16
            np_i = pad_dims[i + 1]
            bias = b_ref[i:i + 1, 0:np_i]            # (1, Np) f32, static lane-aligned slice
            y = jnp.dot(h, w_ref[...], preferred_element_type=jnp.float32) + bias
            if i < n_layers - 1:
                h = jnp.maximum(y, 0.0).astype(jnp.bfloat16)   # bf16 feed for next MXU pass
            else:
                h = y                                          # final layer: no ReLU
        o_ref[...] = h.astype(o_ref.dtype)           # lane-dense store, directly in x.dtype

    return kernel


# ---------------------------------------------------------------------------
# Forward wrapper.
# ---------------------------------------------------------------------------
def dnn_forward_pallas(x, prepared, *, row_tile=512):
    """x: (timesteps, batch, embed_dim). `prepared` comes from prepare_params()."""
    t, b, d = x.shape
    m = t * b
    dims = prepared["dims"]
    pad_dims = prepared["pad_dims"]
    weights = prepared["weights"]
    b_packed = prepared["bias_packed"]
    assert d == dims[0] == dims[-1]
    n_layers = len(weights)

    # Generation-aware VMEM budget (64 MiB/TC on v7x, 128 MiB on v5e/v6e).
    try:
        vmem_cap = int(pltpu.get_tpu_info().vmem_capacity_bytes)
    except Exception:
        vmem_cap = 64 * 1024 * 1024   # conservative (v7x-sized) fallback
    vmem_budget = max(vmem_cap - (16 << 20), 16 << 20)   # headroom for compiler scratch

    single_buffer = _buffered_weights_supported()
    weight_bytes = (sum(int(a.size) * a.dtype.itemsize for a in weights)
                    + int(b_packed.size) * 4)
    resident_weight_bytes = weight_bytes if single_buffer else 2 * weight_bytes

    max_pad = max(pad_dims)

    def tile_bytes(rt):
        io = 2 * (rt * pad_dims[0] * 4 + rt * pad_dims[-1] * x.dtype.itemsize)  # 2x-buffered I/O
        act = 2 * rt * max_pad * 4     # f32 activation spill of the fused 6-layer chain
        return io + act

    # Row tiling: start big, clamp to M, shrink if VMEM would overflow, then make
    # sure the grid has >= 2 steps so "parallel" can split across 2 TensorCores.
    row_tile = max(8, min(row_tile, _round_up(m, 8)))
    while row_tile > 8 and resident_weight_bytes + tile_bytes(row_tile) > vmem_budget:
        row_tile = max(8, _round_up(row_tile // 2, 8))
    if m > 8:
        while row_tile > 8 and _round_up(m, row_tile) // row_tile < 2:
            row_tile = max(8, _round_up(row_tile // 2, 8))
    m_pad = _round_up(m, row_tile)
    grid = m_pad // row_tile

    # TODO(synk): for very large embed_dim (~224+ on v7x) the six resident weight
    # matrices exceed the VMEM budget; add an N/K-tiled (emit_pipeline) fallback for
    # the 10E x 10E layers instead of keeping all weights resident.

    vmem_limit = int(min(vmem_budget,
                         resident_weight_bytes + tile_bytes(row_tile) + (4 << 20)))
    vmem_limit = max(vmem_limit, 8 << 20)

    flops = 2 * m_pad * sum(pad_dims[i] * pad_dims[i + 1] for i in range(n_layers))
    bytes_accessed = (m_pad * pad_dims[0] * 4
                      + m_pad * pad_dims[-1] * x.dtype.itemsize
                      + weight_bytes)
    cost = pl.CostEstimate(flops=int(flops), transcendentals=0,
                           bytes_accessed=int(bytes_accessed))

    # Feed x as f32; only materialize a padded copy when shapes require it.
    x_flat = x.reshape(m, d).astype(jnp.float32)
    needs_pad = (m_pad != m) or (pad_dims[0] != d)
    if needs_pad:
        x_in = jnp.zeros((m_pad, pad_dims[0]), jnp.float32).at[:m, :d].set(x_flat)
    else:
        x_in = x_flat

    def const_spec(shape):
        if single_buffer:
            return pl.BlockSpec(shape, lambda i: (0, 0), pipeline_mode=pl.Buffered(1))
        return pl.BlockSpec(shape, lambda i: (0, 0))

    in_specs = [pl.BlockSpec((row_tile, pad_dims[0]), lambda i: (i, 0))]
    in_specs += [const_spec(w.shape) for w in weights]
    in_specs += [const_spec(b_packed.shape)]

    out = pl.pallas_call(
        _make_kernel(pad_dims),
        out_shape=jax.ShapeDtypeStruct((m_pad, pad_dims[-1]), x.dtype),
        grid_spec=pltpu.PrefetchScalarGridSpec(
            num_scalar_prefetch=0,
            grid=(grid,),
            in_specs=in_specs,
            out_specs=pl.BlockSpec((row_tile, pad_dims[-1]), lambda i: (i, 0)),
        ),
        compiler_params=pltpu.CompilerParams(
            dimension_semantics=("parallel",),
            vmem_limit_bytes=vmem_limit),
        cost_estimate=cost,
    )(x_in, *weights, b_packed)

    if (m_pad != m) or (pad_dims[-1] != d):
        out = out[:m, :d]
    return out.reshape(t, b, d)


# ---------------------------------------------------------------------------
# Reference / init helpers.
# ---------------------------------------------------------------------------
def init_params(key, embed_dim):
    """Deterministic init mimicking torch.nn.Linear (U(-1/sqrt(fan_in), +1/sqrt(fan_in)))."""
    dims = [embed_dim,
            embed_dim * 10, embed_dim * 10, embed_dim * 5,
            embed_dim * 10, embed_dim * 10, embed_dim]
    params = []
    for i in range(6):
        fan_in, fan_out = dims[i], dims[i + 1]
        key, kw, kb = jax.random.split(key, 3)
        bound = 1.0 / math.sqrt(fan_in)
        w = jax.random.uniform(kw, (fan_out, fan_in), jnp.float32, -bound, bound)
        b = jax.random.uniform(kb, (fan_out,), jnp.float32, -bound, bound)
        params.append((w, b))
    return params


def dnn_forward_ref(x, params, compute_dtype=jnp.float32):
    """Pure-JAX reference matching the PyTorch forward. compute_dtype=bf16 mimics the
    kernel's mixed precision (bf16 matmul operands, f32 accumulation, f32 bias)."""
    t, b, d = x.shape
    h = x.reshape(-1, d).astype(compute_dtype)
    for i, (w, bias) in enumerate(params):
        y = jnp.dot(h, w.T.astype(compute_dtype),
                    preferred_element_type=jnp.float32) + bias
        if i < len(params) - 1:
            h = jnp.maximum(y, 0.0).astype(compute_dtype)
        else:
            h = y
    return h.astype(jnp.float32).reshape(t, b, d)


if __name__ == "__main__":
    embed_dim = 8
    timesteps = 8
    batch = 2

    key = jax.random.PRNGKey(0)
    key, kx = jax.random.split(key)
    x = jax.random.normal(kx, (timesteps, batch, embed_dim), jnp.float32)
    params = init_params(key, embed_dim)

    prepared = prepare_params(params)            # one-time weight prep (hoisted)

    y = dnn_forward_pallas(x, prepared)
    y = jax.block_until_ready(y)
    assert y.shape == (timesteps, batch, embed_dim)

    # Check against a reference that mimics the kernel's mixed precision.
    y_mixed = dnn_forward_ref(x, params, compute_dtype=jnp.bfloat16)
    assert jnp.allclose(y, y_mixed, atol=1e-2, rtol=1e-2), \
        f"max |diff| vs mixed ref = {float(jnp.max(jnp.abs(y - y_mixed)))}"

    # Loose check against the full-f32 reference (bf16 weights/activations by design).
    y_ref = dnn_forward_ref(x, params, compute_dtype=jnp.float32)
    assert jnp.allclose(y, y_ref, atol=1e-1, rtol=1e-1), \
        f"max |diff| vs f32 ref = {float(jnp.max(jnp.abs(y - y_ref)))}"

    print("KERNEL_OK")
</pallas_src>

<mosaic_0001>
module attributes {stable_mosaic.version = 11 : i64} {
  func.func @kernel(%arg0: i32, %arg1: memref<8x128xf32, #tpu.memory_space<vmem>>, %arg2: memref<128x128xbf16, #tpu.memory_space<vmem>>, %arg3: memref<128x128xbf16, #tpu.memory_space<vmem>>, %arg4: memref<128x128xbf16, #tpu.memory_space<vmem>>, %arg5: memref<128x128xbf16, #tpu.memory_space<vmem>>, %arg6: memref<128x128xbf16, #tpu.memory_space<vmem>>, %arg7: memref<128x128xbf16, #tpu.memory_space<vmem>>, %arg8: memref<8x128xf32, #tpu.memory_space<vmem>>, %arg9: memref<8x128xf32, #tpu.memory_space<vmem>>) attributes {dimension_semantics = [#tpu.dimension_semantics<parallel>], iteration_bounds = array<i64: 2>, scalar_prefetch = 0 : i64, scratch_operands = 0 : i64, tpu.core_type = #tpu.core_type<tc>, window_params = [{transform_indices = @transform_0, window_bounds = array<i64: 8, 128>}, {pipeline_mode = #tpu.pipeline_mode<synchronous>, transform_indices = @transform_1, window_bounds = array<i64: 128, 128>}, {pipeline_mode = #tpu.pipeline_mode<synchronous>, transform_indices = @transform_2, window_bounds = array<i64: 128, 128>}, {pipeline_mode = #tpu.pipeline_mode<synchronous>, transform_indices = @transform_3, window_bounds = array<i64: 128, 128>}, {pipeline_mode = #tpu.pipeline_mode<synchronous>, transform_indices = @transform_4, window_bounds = array<i64: 128, 128>}, {pipeline_mode = #tpu.pipeline_mode<synchronous>, transform_indices = @transform_5, window_bounds = array<i64: 128, 128>}, {pipeline_mode = #tpu.pipeline_mode<synchronous>, transform_indices = @transform_6, window_bounds = array<i64: 128, 128>}, {pipeline_mode = #tpu.pipeline_mode<synchronous>, transform_indices = @transform_7, window_bounds = array<i64: 8, 128>}, {transform_indices = @transform_8, window_bounds = array<i64: 8, 128>}]} {
    %c0 = arith.constant 0 : index
    %c0_0 = arith.constant 0 : index
    %0 = vector.load %arg1[%c0, %c0_0] : memref<8x128xf32, #tpu.memory_space<vmem>>, vector<8x128xf32>
    %1 = arith.truncf %0 : vector<8x128xf32> to vector<8x128xbf16>
    %c0_1 = arith.constant 0 : index
    %c0_2 = arith.constant 0 : index
    %2 = vector.load %arg8[%c0_1, %c0_2] : memref<8x128xf32, #tpu.memory_space<vmem>>, vector<1x128xf32>
    %c0_3 = arith.constant 0 : index
    %c0_4 = arith.constant 0 : index
    %3 = vector.load %arg2[%c0_3, %c0_4] : memref<128x128xbf16, #tpu.memory_space<vmem>>, vector<128x128xbf16>
    %cst = arith.constant dense<0.000000e+00> : vector<8x128xf32>
    %4 = tpu.matmul %1, %3, %cst {dimension_numbers = #tpu.dot_dimension_numbers<[1], [0], [0], [1], [0, 0, 1, 1], [], []>} : vector<8x128xbf16>, vector<128x128xbf16>, vector<8x128xf32> -> vector<8x128xf32>
    %5 = vector.broadcast %2 : vector<1x128xf32> to vector<8x128xf32>
    %6 = arith.addf %4, %5 : vector<8x128xf32>
    %cst_5 = arith.constant 0.000000e+00 : f32
    %7 = vector.broadcast %cst_5 : f32 to vector<8x128xf32>
    %8 = arith.maximumf %6, %7 : vector<8x128xf32>
    %9 = arith.truncf %8 : vector<8x128xf32> to vector<8x128xbf16>
    %c1 = arith.constant 1 : index
    %c0_6 = arith.constant 0 : index
    %10 = vector.load %arg8[%c1, %c0_6] : memref<8x128xf32, #tpu.memory_space<vmem>>, vector<1x128xf32>
    %c0_7 = arith.constant 0 : index
    %c0_8 = arith.constant 0 : index
    %11 = vector.load %arg3[%c0_7, %c0_8] : memref<128x128xbf16, #tpu.memory_space<vmem>>, vector<128x128xbf16>
    %cst_9 = arith.constant dense<0.000000e+00> : vector<8x128xf32>
    %12 = tpu.matmul %9, %11, %cst_9 {dimension_numbers = #tpu.dot_dimension_numbers<[1], [0], [0], [1], [0, 0, 1, 1], [], []>} : vector<8x128xbf16>, vector<128x128xbf16>, vector<8x128xf32> -> vector<8x128xf32>
    %13 = vector.broadcast %10 : vector<1x128xf32> to vector<8x128xf32>
    %14 = arith.addf %12, %13 : vector<8x128xf32>
    %cst_10 = arith.constant 0.000000e+00 : f32
    %15 = vector.broadcast %cst_10 : f32 to vector<8x128xf32>
    %16 = arith.maximumf %14, %15 : vector<8x128xf32>
    %17 = arith.truncf %16 : vector<8x128xf32> to vector<8x128xbf16>
    %c2 = arith.constant 2 : index
    %c0_11 = arith.constant 0 : index
    %18 = vector.load %arg8[%c2, %c0_11] : memref<8x128xf32, #tpu.memory_space<vmem>>, vector<1x128xf32>
    %c0_12 = arith.constant 0 : index
    %c0_13 = arith.constant 0 : index
    %19 = vector.load %arg4[%c0_12, %c0_13] : memref<128x128xbf16, #tpu.memory_space<vmem>>, vector<128x128xbf16>
    %cst_14 = arith.constant dense<0.000000e+00> : vector<8x128xf32>
    %20 = tpu.matmul %17, %19, %cst_14 {dimension_numbers = #tpu.dot_dimension_numbers<[1], [0], [0], [1], [0, 0, 1, 1], [], []>} : vector<8x128xbf16>, vector<128x128xbf16>, vector<8x128xf32> -> vector<8x128xf32>
    %21 = vector.broadcast %18 : vector<1x128xf32> to vector<8x128xf32>
    %22 = arith.addf %20, %21 : vector<8x128xf32>
    %cst_15 = arith.constant 0.000000e+00 : f32
    %23 = vector.broadcast %cst_15 : f32 to vector<8x128xf32>
    %24 = arith.maximumf %22, %23 : vector<8x128xf32>
    %25 = arith.truncf %24 : vector<8x128xf32> to vector<8x128xbf16>
    %c3 = arith.constant 3 : index
    %c0_16 = arith.constant 0 : index
    %26 = vector.load %arg8[%c3, %c0_16] : memref<8x128xf32, #tpu.memory_space<vmem>>, vector<1x128xf32>
    %c0_17 = arith.constant 0 : index
    %c0_18 = arith.constant 0 : index
    %27 = vector.load %arg5[%c0_17, %c0_18] : memref<128x128xbf16, #tpu.memory_space<vmem>>, vector<128x128xbf16>
    %cst_19 = arith.constant dense<0.000000e+00> : vector<8x128xf32>
    %28 = tpu.matmul %25, %27, %cst_19 {dimension_numbers = #tpu.dot_dimension_numbers<[1], [0], [0], [1], [0, 0, 1, 1], [], []>} : vector<8x128xbf16>, vector<128x128xbf16>, vector<8x128xf32> -> vector<8x128xf32>
    %29 = vector.broadcast %26 : vector<1x128xf32> to vector<8x128xf32>
    %30 = arith.addf %28, %29 : vector<8x128xf32>
    %cst_20 = arith.constant 0.000000e+00 : f32
    %31 = vector.broadcast %cst_20 : f32 to vector<8x128xf32>
    %32 = arith.maximumf %30, %31 : vector<8x128xf32>
    %33 = arith.truncf %32 : vector<8x128xf32> to vector<8x128xbf16>
    %c4 = arith.constant 4 : index
    %c0_21 = arith.constant 0 : index
    %34 = vector.load %arg8[%c4, %c0_21] : memref<8x128xf32, #tpu.memory_space<vmem>>, vector<1x128xf32>
    %c0_22 = arith.constant 0 : index
    %c0_23 = arith.constant 0 : index
    %35 = vector.load %arg6[%c0_22, %c0_23] : memref<128x128xbf16, #tpu.memory_space<vmem>>, vector<128x128xbf16>
    %cst_24 = arith.constant dense<0.000000e+00> : vector<8x128xf32>
    %36 = tpu.matmul %33, %35, %cst_24 {dimension_numbers = #tpu.dot_dimension_numbers<[1], [0], [0], [1], [0, 0, 1, 1], [], []>} : vector<8x128xbf16>, vector<128x128xbf16>, vector<8x128xf32> -> vector<8x128xf32>
    %37 = vector.broadcast %34 : vector<1x128xf32> to vector<8x128xf32>
    %38 = arith.addf %36, %37 : vector<8x128xf32>
    %cst_25 = arith.constant 0.000000e+00 : f32
    %39 = vector.broadcast %cst_25 : f32 to vector<8x128xf32>
    %40 = arith.maximumf %38, %39 : vector<8x128xf32>
    %41 = arith.truncf %40 : vector<8x128xf32> to vector<8x128xbf16>
    %c5 = arith.constant 5 : index
    %c0_26 = arith.constant 0 : index
    %42 = vector.load %arg8[%c5, %c0_26] : memref<8x128xf32, #tpu.memory_space<vmem>>, vector<1x128xf32>
    %c0_27 = arith.constant 0 : index
    %c0_28 = arith.constant 0 : index
    %43 = vector.load %arg7[%c0_27, %c0_28] : memref<128x128xbf16, #tpu.memory_space<vmem>>, vector<128x128xbf16>
    %cst_29 = arith.constant dense<0.000000e+00> : vector<8x128xf32>
    %44 = tpu.matmul %41, %43, %cst_29 {dimension_numbers = #tpu.dot_dimension_numbers<[1], [0], [0], [1], [0, 0, 1, 1], [], []>} : vector<8x128xbf16>, vector<128x128xbf16>, vector<8x128xf32> -> vector<8x128xf32>
    %45 = vector.broadcast %42 : vector<1x128xf32> to vector<8x128xf32>
    %46 = arith.addf %44, %45 : vector<8x128xf32>
    %c0_30 = arith.constant 0 : index
    %c0_31 = arith.constant 0 : index
    %47 = vector.load %arg9[%c0_30, %c0_31] : memref<8x128xf32, #tpu.memory_space<vmem>>, vector<8x128xf32>
    tpu.vector_store %arg9[%c0_30, %c0_31], %46 {strides = array<i32>} : memref<8x128xf32, #tpu.memory_space<vmem>>, vector<8x128xf32>,
    return
  }
  func.func @transform_0(%arg0: i32) -> (i32, i32) {
    %c0_i32 = arith.constant 0 : i32
    %c0_i32_0 = arith.constant 0 : i32
    return %arg0, %c0_i32 : i32, i32
  }
  func.func @transform_1(%arg0: i32) -> (i32, i32) {
    %c0_i32 = arith.constant 0 : i32
    %c0_i32_0 = arith.constant 0 : i32
    %c0_i32_1 = arith.constant 0 : i32
    return %c0_i32, %c0_i32_0 : i32, i32
  }
  func.func @transform_2(%arg0: i32) -> (i32, i32) {
    %c0_i32 = arith.constant 0 : i32
    %c0_i32_0 = arith.constant 0 : i32
    %c0_i32_1 = arith.constant 0 : i32
    return %c0_i32, %c0_i32_0 : i32, i32
  }
  func.func @transform_3(%arg0: i32) -> (i32, i32) {
    %c0_i32 = arith.constant 0 : i32
    %c0_i32_0 = arith.constant 0 : i32
    %c0_i32_1 = arith.constant 0 : i32
    return %c0_i32, %c0_i32_0 : i32, i32
  }
  func.func @transform_4(%arg0: i32) -> (i32, i32) {
    %c0_i32 = arith.constant 0 : i32
    %c0_i32_0 = arith.constant 0 : i32
    %c0_i32_1 = arith.constant 0 : i32
    return %c0_i32, %c0_i32_0 : i32, i32
  }
  func.func @transform_5(%arg0: i32) -> (i32, i32) {
    %c0_i32 = arith.constant 0 : i32
    %c0_i32_0 = arith.constant 0 : i32
    %c0_i32_1 = arith.constant 0 : i32
    return %c0_i32, %c0_i32_0 : i32, i32
  }
  func.func @transform_6(%arg0: i32) -> (i32, i32) {
    %c0_i32 = arith.constant 0 : i32
    %c0_i32_0 = arith.constant 0 : i32
    %c0_i32_1 = arith.constant 0 : i32
    return %c0_i32, %c0_i32_0 : i32, i32
  }
  func.func @transform_7(%arg0: i32) -> (i32, i32) {
    %c0_i32 = arith.constant 0 : i32
    %c0_i32_0 = arith.constant 0 : i32
    %c0_i32_1 = arith.constant 0 : i32
    return %c0_i32, %c0_i32_0 : i32, i32
  }
  func.func @transform_8(%arg0: i32) -> (i32, i32) {
    %c0_i32 = arith.constant 0 : i32
    %c0_i32_0 = arith.constant 0 : i32
    return %arg0, %c0_i32 : i32, i32
  }
}

</mosaic_0001>

<bundles_post_ra>
// kernel: tpu_custom_call.1
= control target key start
LH: loop header
LB: loop body
LE: loop exit
PB: predicated region body
PF: predicated region fallthrough
CT: control target
= control target key end

     0   :  { %s2386_s0 = inlined_call_operand.hbm [shape: f32[16,128], index: 0, kind: input, shape index: {}]   ;;  %s2387_s1 = inlined_call_operand.hbm [shape: bf16[128,128], index: 1, kind: input, shape index: {}]   ;;  %s2388_s2 = inlined_call_operand.hbm [shape: bf16[128,128], index: 2, kind: input, shape index: {}]   ;;  %s2389_s3 = inlined_call_operand.hbm [shape: bf16[128,128], index: 3, kind: input, shape index: {}]   ;;  %s2390_s4 = inlined_call_operand.hbm [shape: bf16[128,128], index: 4, kind: input, shape index: {}]   ;;  %s2391_s5 = inlined_call_operand.hbm [shape: bf16[128,128], index: 5, kind: input, shape index: {}]   ;;  %s2392_s6 = inlined_call_operand.hbm [shape: bf16[128,128], index: 6, kind: input, shape index: {}]   ;;  %s2393_s7 = inlined_call_operand.vmem [shape: f32[8,128], index: 7, kind: input, shape index: {}]   ;;  %s2394_s8 = inlined_call_operand.hbm [shape: f32[16,128], index: 8, kind: output, shape index: {}]  }
   0x1   :  { %2398 = sst [smem:[#allocation20_spill]] %s2387_s1 }
   0x2   :  { %13 = vsyncpa [#allocation3], 0 }
   0x3   :  { %15 = vsyncpa [#allocation3 + $0x1], 0 }
   0x4   :  { %16 = vsyncpa [#allocation6], 0 }
   0x5   :  { %17 = vsyncpa [#allocation9], 0 }
   0x6   :  { %18 = vsyncpa [#allocation12], 0 }
   0x7   :  { %19 = vsyncpa [#allocation4], 0 }
   0x8   :  { %21 = vsyncpa [#allocation4 + $0x1], 0  ;;  %s1963_s27 = smov 0   ;;  %s1965_s28 = smov 0  }
   0x9   :  { %s1967_s29 = smov 0   ;;  %s1969_s30 = smov 0  }
   0xa LB: > { %s1906_s9 = smov [#allocation5]   ;;  %s1984_s11 = sadd.s32 4294967295, %s1904_s30   ;;  %s1904_s30 = sphi %s1969_s30, %s2422_s30   ;;  %s1900_s29 = sphi %s1967_s29, %s2421_s29   ;;  %s1896_s28 = sphi %s1965_s28, %s2420_s28   ;;  %s1892_s27 = sphi %s1963_s27, %s2419_s27  }
   0xb   : > { %s243_s10 = sshll.u32 %s1906_s9, 4  ;;  %p1218_p0 = scmp.ge.s32.totalorder %s1904_s30, 1  ;;  %s1989_s10 = int_to_ptr.vmem [resolvable:$true] %s243_s10 }
   0xc   : > { %p2395_p1 = scmp.eq.s32.totalorder %s1984_s11, 0  ;;  %p231_p2 = scmp.lt.s32.totalorder %s1904_s30, 3 }
   0xd   : > { %s1907_s13 = smov [#allocation8]   ;;  %s1908_s16 = smov [#allocation11]  }
   0xe   : > { %p1991_p3 = pnand %p1218_p0, %p231_p2  ;;  %s269_s14 = sshll.u32 %s1907_s13, 4  ;;  %s2004_s14 = int_to_ptr.vmem [resolvable:$true] %s269_s14 }
   0xf   : > { %s295_s17 = sshll.u32 %s1908_s16, 4  ;;  %s2401_s1 = sld [smem:[#allocation20_spill]]  ;;  %s2006_s17 = int_to_ptr.vmem [resolvable:$true] %s295_s17 }
  0x10   : > { %s2399_s12 = scalar_select %p1991_p3, 1, 0 }
  0x11   : > { %p1497_p5 = pneg %p1991_p3 }
  0x13   : > { %p2000_p6 = pnand %p1497_p5, %p2395_p1 }
  0x15   : > { %s1628_s20 = scalar_lea.hbm %s2401_s1, 1024  ;;  %p2016_p8 = pneg %p2000_p6 }
  0x16   : > { %p1629_p7 = scmp.ne.s32.totalorder %s2401_s1, %s1628_s20  ;;  %p1635_p11 = scmp.lt.u32.totalorder %s1628_s20, %s2401_s1 }
  0x18   : > { %p1631_p9 = pnand %p2016_p8, %p1629_p7 }
  0x1a   : > { %p1632_p10 = pneg %p1631_p9 }
  0x1c   : > { %p1637_p12 = pnand %p1635_p11, %p1632_p10 }
  0x1e   : > { %1640 = shalt.err (!%p1637_p12)
}
  0x1f   : > { %s1641_s26 = scalar_lea.vmem %s1989_s10, 1024  ;;  %p1649_p5 = scmp.lt.s32.totalorder %s1989_s10, %s1989_s10 }
  0x20   : > { %p1642_p13 = scmp.ne.s32.totalorder %s1989_s10, %s1641_s26  ;;  %p1650_p4 = scmp.lt.s32.totalorder %s1641_s26, %s1641_s26 }
  0x22   : > { %p1644_p0 = pnand %p1642_p13, %p2016_p8  ;;  %p1651_p7 = por %p1650_p4, %p1649_p5 }
  0x24   : > { %p1645_p2 = pneg %p1644_p0 }
  0x26   : > { %p1652_p9 = pnand %p1651_p7, %p1645_p2 }
  0x28   : > { %1655 = shalt.err (!%p1652_p9)
}
  0x29   : > { %s1909_s9 = smov 64   ;;  %s1910_s13 = smov 4  }
  0x2a   : > { %1500 = dma.hbm_to_vmem [thread:$0]  (!%p2000_p6), %s2401_s1, 1024, %s1989_s10, [#allocation6], %s1909_s9, %s1909_s9, %s1910_s13  }
  0x2b   : > { %s1656_s21 = scalar_lea.hbm %s2389_s3, 1024 }
  0x2c   : > { %p1657_p4 = scmp.ne.s32.totalorder %s2389_s3, %s1656_s21  ;;  %p1663_p12 = scmp.lt.u32.totalorder %s1656_s21, %s2389_s3 }
  0x2e   : > { %p1659_p10 = pnand %p1657_p4, %p2016_p8 }
  0x30   : > { %p1660_p11 = pneg %p1659_p10 }
  0x32   : > { %p1665_p13 = pnand %p1663_p12, %p1660_p11 }
  0x34   : > { %1668 = shalt.err (!%p1665_p13)
}
  0x35   : > { %s1669_s10 = scalar_lea.vmem %s2004_s14, 1024  ;;  %p1677_p7 = scmp.lt.s32.totalorder %s2004_s14, %s2004_s14 }
  0x36   : > { %p1670_p0 = scmp.ne.s32.totalorder %s2004_s14, %s1669_s10  ;;  %p1678_p9 = scmp.lt.s32.totalorder %s1669_s10, %s1669_s10 }
  0x38   : > { %p1672_p2 = pnand %p1670_p0, %p2016_p8  ;;  %p1679_p4 = por %p1678_p9, %p1677_p7 }
  0x3a   : > { %p1673_p5 = pneg %p1672_p2 }
  0x3c   : > { %p1680_p10 = pnand %p1679_p4, %p1673_p5 }
  0x3e   : > { %1683 = shalt.err (!%p1680_p10)
}
  0x3f   : > { %1506 = dma.hbm_to_vmem [thread:$0]  (!%p2000_p6), %s2389_s3, 1024, %s2004_s14, [#allocation9], %s1909_s9, %s1909_s9, %s1910_s13  }
  0x40   : > { %s1684_s21 = scalar_lea.hbm %s2391_s5, 1024 }
  0x41   : > { %p1685_p11 = scmp.ne.s32.totalorder %s2391_s5, %s1684_s21  ;;  %p1691_p0 = scmp.lt.u32.totalorder %s1684_s21, %s2391_s5 }
  0x43   : > { %p1687_p12 = pnand %p1685_p11, %p2016_p8 }
  0x45   : > { %p1688_p13 = pneg %p1687_p12 }
  0x47   : > { %p1693_p2 = pnand %p1691_p0, %p1688_p13 }
  0x49   : > { %1696 = shalt.err (!%p1693_p2)
}
  0x4a   : > { %s1697_s14 = scalar_lea.vmem %s2006_s17, 1024  ;;  %p1705_p4 = scmp.lt.s32.totalorder %s2006_s17, %s2006_s17 }
  0x4b   : > { %p1698_p5 = scmp.ne.s32.totalorder %s2006_s17, %s1697_s14  ;;  %p1706_p10 = scmp.lt.s32.totalorder %s1697_s14, %s1697_s14 }
  0x4d   : > { %p1700_p7 = pnand %p1698_p5, %p2016_p8  ;;  %p1707_p11 = por %p1706_p10, %p1705_p4 }
  0x4f   : > { %p1701_p9 = pneg %p1700_p7 }
  0x51   : > { %p1708_p12 = pnand %p1707_p11, %p1701_p9 }
  0x53   : > { %1711 = shalt.err (!%p1708_p12)
}
  0x54   : > { %1512 = dma.hbm_to_vmem [thread:$0]  (!%p2000_p6), %s2391_s5, 1024, %s2006_s17, [#allocation12], %s1909_s9, %s1909_s9, %s1910_s13  }
  0x55   : > { %s1911_s18 = smov [#allocation7]   ;;  %s1912_s20 = smov [#allocation10]  }
  0x56   : > { %s256_s19 = sshll.u32 %s1911_s18, 4  ;;  %s282_s21 = sshll.u32 %s1912_s20, 4  ;;  %s257_s19 = int_to_ptr.vmem [resolvable:$true] %s256_s19  ;;  %s283_s21 = int_to_ptr.vmem [resolvable:$true] %s282_s21 }
  0x57   : > { %s1712_s25 = scalar_lea.hbm %s2388_s2, 1024 }
  0x58   : > { %p1713_p13 = scmp.ne.s32.totalorder %s2388_s2, %s1712_s25  ;;  %p1719_p5 = scmp.lt.u32.totalorder %s1712_s25, %s2388_s2 }
  0x5a   : > { %p1715_p0 = pnand %p1713_p13, %p2016_p8 }
  0x5c   : > { %p1716_p2 = pneg %p1715_p0 }
  0x5e   : > { %p1721_p7 = pnand %p1719_p5, %p1716_p2 }
  0x60   : > { %1724 = shalt.err (!%p1721_p7)
}
  0x61   : > { %s1725_s17 = scalar_lea.vmem %s257_s19, 1024  ;;  %p1733_p11 = scmp.lt.s32.totalorder %s257_s19, %s257_s19 }
  0x62   : > { %p1726_p9 = scmp.ne.s32.totalorder %s257_s19, %s1725_s17  ;;  %p1734_p12 = scmp.lt.s32.totalorder %s1725_s17, %s1725_s17 }
  0x64   : > { %p1728_p4 = pnand %p1726_p9, %p2016_p8  ;;  %p1735_p1 = por %p1734_p12, %p1733_p11 }
  0x66   : > { %p1729_p10 = pneg %p1728_p4 }
  0x68   : > { %p1736_p3 = pnand %p1735_p1, %p1729_p10 }
  0x6a   : > { %1739 = shalt.err (!%p1736_p3)
}
  0x6b   : > { %1503 = dma.hbm_to_vmem [thread:$0]  (!%p2000_p6), %s2388_s2, 1024, %s257_s19, [#allocation6], %s1909_s9, %s1909_s9, %s1910_s13  }
  0x6c   : > { %s1740_s22 = scalar_lea.hbm %s2390_s4, 1024 }
  0x6d   : > { %p1741_p1 = scmp.ne.s32.totalorder %s2390_s4, %s1740_s22  ;;  %p1747_p0 = scmp.lt.u32.totalorder %s1740_s22, %s2390_s4 }
  0x6f   : > { %p1743_p3 = pnand %p1741_p1, %p2016_p8 }
  0x71   : > { %p1744_p13 = pneg %p1743_p3 }
  0x73   : > { %p1749_p2 = pnand %p1747_p0, %p1744_p13 }
  0x75   : > { %1752 = shalt.err (!%p1749_p2)
}
  0x76   : > { %s1753_s10 = scalar_lea.vmem %s283_s21, 1024  ;;  %p1761_p4 = scmp.lt.s32.totalorder %s283_s21, %s283_s21 }
  0x77   : > { %p1754_p5 = scmp.ne.s32.totalorder %s283_s21, %s1753_s10  ;;  %p1762_p10 = scmp.lt.s32.totalorder %s1753_s10, %s1753_s10 }
  0x79   : > { %p1756_p7 = pnand %p1754_p5, %p2016_p8  ;;  %p1763_p11 = por %p1762_p10, %p1761_p4 }
  0x7b   : > { %p1757_p9 = pneg %p1756_p7 }
  0x7d   : > { %p1764_p12 = pnand %p1763_p11, %p1757_p9 }
  0x7f   : > { %1767 = shalt.err (!%p1764_p12)
}
  0x80   : > { %1509 = dma.hbm_to_vmem [thread:$0]  (!%p2000_p6), %s2390_s4, 1024, %s283_s21, [#allocation9], %s1909_s9, %s1909_s9, %s1910_s13  }
  0x81   : > { %s1913_s1 = smov [#allocation13]   ;;  %s1768_s22 = scalar_lea.hbm %s2392_s6, 1024 }
  0x82   : > { %s308_s16 = sshll.u32 %s1913_s1, 4  ;;  %p1769_p1 = scmp.ne.s32.totalorder %s2392_s6, %s1768_s22  ;;  %s309_s16 = int_to_ptr.vmem [resolvable:$true] %s308_s16 }
  0x83   : > { %p1775_p0 = scmp.lt.u32.totalorder %s1768_s22, %s2392_s6 }
  0x84   : > { %p1771_p3 = pnand %p1769_p1, %p2016_p8 }
  0x86   : > { %p1772_p13 = pneg %p1771_p3 }
  0x88   : > { %p1777_p2 = pnand %p1775_p0, %p1772_p13 }
  0x8a   : > { %1780 = shalt.err (!%p1777_p2)
}
  0x8b   : > { %s1781_s21 = scalar_lea.vmem %s309_s16, 1024  ;;  %p1789_p4 = scmp.lt.s32.totalorder %s309_s16, %s309_s16 }
  0x8c   : > { %p1782_p5 = scmp.ne.s32.totalorder %s309_s16, %s1781_s21  ;;  %p1790_p10 = scmp.lt.s32.totalorder %s1781_s21, %s1781_s21 }
  0x8e   : > { %p1784_p7 = pnand %p1782_p5, %p2016_p8  ;;  %p1791_p11 = por %p1790_p10, %p1789_p4 }
  0x90   : > { %p1785_p9 = pneg %p1784_p7 }
  0x92   : > { %p1792_p12 = pnand %p1791_p11, %p1785_p9 }
  0x94   : > { %1795 = shalt.err (!%p1792_p12)
}
  0x95   : > { %1515 = dma.hbm_to_vmem [thread:$0]  (!%p2000_p6), %s2392_s6, 1024, %s309_s16, [#allocation12], %s1909_s9, %s1909_s9, %s1910_s13  }
  0x96   : > { %s1217_s15 = sadd.s32 4294967294, %s1904_s30   ;;  %s2157_s23 = sadd.s32 1, %s1904_s30  }
  0x97   : > { %s31_s17 = ssub.s32 %s1904_s30, %s2157_s23  ;;  %s34_s1 = sadd.s32 1, %s1900_s29 }
  0x98   : > { %p32_p8 = scmp.eq.s32.totalorder %s31_s17, 0  ;;  %p41_p1 = scmp.ne.s32.totalorder %s1900_s29, %s1896_s28 }
  0x99   : > { %p42_p3 = scmp.eq.s32.totalorder %s1904_s30, 0  ;;  %p47_p13 = scmp.ne.s32.totalorder %s1896_s28, %s1892_s27 }
  0x9a   : > { %s2168_s18 = scalar_select %p32_p8, %s1900_s29, %s34_s1  }
  0x9b   : > { %p2170_p0 = por %p42_p3, %p41_p1  ;;  %p2404_p2 = scmp.eq.s32.totalorder %s1984_s11, 0 }
  0x9c   : > { %p218_p5 = scmp.eq.s32.totalorder %s1984_s11, 1  ;;  %p224_p7 = scmp.eq.s32.totalorder %s1217_s15, 1 }
  0x9d   : > { %p2176_p6 = por %p2404_p2, %p47_p13  ;;  %p1530_p9 = scmp.lt.s32.totalorder %s1904_s30, 2 }
  0x9e   : > { %s325_s13 = sand.u32 1, %s1900_s29   ;;  %p2183_p4 = por %p218_p5, %p41_p1 }
  0x9f   : > { %p2187_p10 = por %p224_p7, %p47_p13  ;;  %s1226_s24 = sshll.u32 %s325_s13, 3 }
  0xa0   : > { %s2406_s16 = scalar_select %p2183_p4, 1, 0 }
  0xa1   : > { %s2407_s22 = scalar_select %p2187_p10, 1, 0 }
  0xa2   : > { %s1227_s25 = sshll.u32 %s1904_s30, 7  ;;  %s329_s10 = scalar_lea.vmem [#allocation2], %s1226_s24 }
  0xa3   : > { %s2195_s21 = scalar_lea.hbm %s2386_s0, %s1227_s25  ;;  %s336_s19 = sshll.u32 %s329_s10, 4  ;;  %s2197_s19 = int_to_ptr.vmem [resolvable:$true] %s336_s19 }
  0xa4   : > { %p2201_p11 = pnand %p1530_p9, %p2170_p0  ;;  %s326_s17 = scalar_lea.sflag [#allocation3], %s325_s13 }
  0xa5   : > { %s1796_s1 = scalar_lea.hbm %s2195_s21, 128  ;;  %s1801_s26 = scalar_lea.hbm %s2386_s0, 256 }
  0xa6   : > { %p1797_p12 = scmp.ne.s32.totalorder %s2195_s21, %s1796_s1  ;;  %p1798_p8 = pneg %p2201_p11 }
  0xa7   : > { %p1802_p13 = scmp.lt.u32.totalorder %s2195_s21, %s2386_s0  ;;  %p1803_p0 = scmp.lt.u32.totalorder %s1801_s26, %s1796_s1 }
  0xa8   : > { %p1799_p1 = pnand %p1798_p8, %p1797_p12  ;;  %p1805_p5 = scmp.lt.u32.totalorder %s1796_s1, %s2195_s21 }
  0xa9   : > { %p1804_p2 = por %p1803_p0, %p1802_p13 }
  0xaa   : > { %p1800_p3 = pneg %p1799_p1 }
  0xab   : > { %p1806_p7 = por %p1805_p5, %p1804_p2 }
  0xad   : > { %p1807_p9 = pnand %p1806_p7, %p1800_p3 }
  0xaf   : > { %1810 = shalt.err (!%p1807_p9)
}
  0xb0   : > { %s1811_s13 = scalar_lea.vmem %s2197_s19, 128  ;;  %s1914_s10 = smov [#allocation2]  }
  0xb1   : > { %p1812_p12 = scmp.ne.s32.totalorder %s2197_s19, %s1811_s13  ;;  %s1816_s24 = sshll.u32 %s1914_s10, 4  ;;  %s1817_s24 = int_to_ptr.vmem [resolvable:$false] %s1816_s24 }
  0xb2   : > { %s1818_s25 = scalar_lea.vmem %s1817_s24, 256  ;;  %p1819_p4 = scmp.lt.s32.totalorder %s2197_s19, %s1817_s24 }
  0xb3   : > { %p1814_p1 = pnand %p1812_p12, %p1798_p8  ;;  %p1820_p13 = scmp.lt.s32.totalorder %s1818_s25, %s1811_s13 }
  0xb5   : > { %p1815_p10 = pneg %p1814_p1  ;;  %p1821_p0 = por %p1820_p13, %p1819_p4 }
  0xb7   : > { %p1822_p2 = pnand %p1821_p0, %p1815_p10 }
  0xb9   : > { %1825 = shalt.err (!%p1822_p2)
}
  0xba   : > { %1519 = dma.hbm_to_vmem [thread:$0]  (!%p2201_p11), %s2195_s21, 128, %s2197_s19, %s326_s17  }
  0xbb   : > { %p2409_p3 = scmp.ne.s32.totalorder %s2399_s12, 0 }
  0xbc   : > { %s2233_s1 = sand.u32 (!%p2409_p3), 1, %s1896_s28  }
  0xbd   : > { %345 = sbr.rel (%p2409_p3) target bundleno = 1558 (0x616), region = 52  ;;  %s1229_s26 = sshll.u32 (!%p2409_p3), %s2233_s1, 3 }
  0xbe   : > { %s348_s20 = scalar_lea.sflag (!%p2409_p3), [#allocation3], %s2233_s1  ;;  %s2239_s14 = scalar_lea.vmem (!%p2409_p3), [#allocation2], %s1229_s26 }
  0xc4   : > { %1871 = dma.done.wait (%p2176_p6), %s348_s20, 128  }
  0xc5   : > { %1873 = vsyncadd (%p2176_p6), %s348_s20, 4294967168  ;;  %p2410_p4 = scmp.eq.s32.totalorder %s1984_s11, 0 }
  0xc7   : > { %1875 = dma.done.wait (%p2410_p4), [#allocation6], 2048   ;;  %p2411_p10 = pmov %p2410_p4 }
  0xc8   : > { %p2412_p11 = pmov %p2410_p4 }
  0xc9   : > { %1877 = vsyncadd (%p2411_p10), [#allocation6], 4294965248 }
  0xca   : > { %1879 = dma.done.wait (%p2412_p11), [#allocation9], 2048   ;;  %p2413_p8 = pmov %p2410_p4 }
  0xcb   : > { %p2414_p5 = pmov %p2410_p4 }
  0xcc   : > { %1881 = vsyncadd (%p2413_p8), [#allocation9], 4294965248 }
  0xcd   : > { %1883 = dma.done.wait (%p2414_p5), [#allocation12], 2048   ;;  %p2415_p7 = pmov %p2410_p4 }
  0xce   : > { %v1915_v0 = vmov 0.0   ;;  %vm1916_vm0 = vmmov 0   ;;  %v1580_v1 = vld [vmem:[#allocation5] sm:$0xff]   ;;  %v1581_v2 = vld [vmem:[#allocation5 + $0x8] sm:$0xff]   ;;  %v1582_v3 = vld [vmem:[#allocation5 + $0x10] sm:$0xff]   ;;  %s1292_s12 = sshll.u32 %s1984_s11, 7 }
  0xcf   : > { %1885 = vsyncadd (%p2415_p7), [#allocation12], 4294965248  ;;  %1349 = vmatprep.subr.bf16.mxu0 %v1915_v0  ;;  %1365 = vmatprep.mubr.msk.bf16.mxu0 %vm1916_vm0, %v1915_v0  ;;  %v1588_v4 = vld [vmem:[#allocation7] sm:$0xff]   ;;  %v1583_v5 = vld [vmem:[#allocation5 + $0x18] sm:$0xff]   ;;  %s407_s9 = scalar_lea.vmem [#allocation14], %s1229_s26  ;;  %s2342_s17 = scalar_lea.hbm %s2394_s8, %s1292_s12 }
  0xd0   : > { %1369 = vmatprep.subr.bf16.mxu1 %v1915_v0  ;;  %1385 = vmatprep.mubr.msk.bf16.mxu1 %vm1916_vm0, %v1915_v0  ;;  %v1589_v6 = vld [vmem:[#allocation7 + $0x8] sm:$0xff]   ;;  %v1584_v7 = vld [vmem:[#allocation5 + $0x20] sm:$0xff]   ;;  %v1590_v8 = vld [vmem:[#allocation7 + $0x10] sm:$0xff]   ;;  %s1090_s21 = sshll.u32 %s407_s9, 4  ;;  %s1077_s11 = scalar_lea.sflag [#allocation4], %s2233_s1  ;;  %s2344_s21 = int_to_ptr.vmem [resolvable:$true] %s1090_s21 }
  0xd1   : > { %1350 = vmatpush3.bf16.msra.mxu0 %v1580_v1  ;;  %1370 = vmatpush3.bf16.msra.mxu1 %v1588_v4  ;;  %v1585_v9 = vld [vmem:[#allocation5 + $0x28] sm:$0xff]   ;;  %v1591_v10 = vld [vmem:[#allocation7 + $0x18] sm:$0xff]   ;;  %v1586_v11 = vld [vmem:[#allocation5 + $0x30] sm:$0xff]   ;;  %s1826_s13 = scalar_lea.vmem %s2344_s21, 128  ;;  %p2416_p9 = scmp.ne.s32.totalorder %s2406_s16, 0 }
  0xd2   : > { %1351 = vmatprep.subr.bf16.mxu0 %v1915_v0  ;;  %1371 = vmatprep.subr.bf16.mxu1 %v1915_v0  ;;  %v1592_v12 = vld [vmem:[#allocation7 + $0x20] sm:$0xff]   ;;  %v1587_v13 = vld [vmem:[#allocation5 + $0x38] sm:$0xff]   ;;  %v1593_v15 = vld [vmem:[#allocation7 + $0x28] sm:$0xff]   ;;  %p1827_p6 = scmp.ne.s32.totalorder %s2344_s21, %s1826_s13  ;;  %s1917_s26 = smov [#allocation14]  }
  0xd3   : > { %v409_v14 = vld [vmem:[%s2239_s14] sm:$0xff]  ;;  %v1596_v19 = vld [vmem:[#allocation8] sm:$0xff]   ;;  %v1597_v20 = vld [vmem:[#allocation8 + $0x8] sm:$0xff]   ;;  %s1830_s10 = sshll.u32 %s1917_s26, 4  ;;  %s1831_s10 = int_to_ptr.vmem [resolvable:$false] %s1830_s10 }
  0xd4   : > { %v410_v16 = vpack.c.bf16 %v409_v14, %v409_v14  ;;  %v1594_v17 = vld [vmem:[#allocation7 + $0x30] sm:$0xff]   ;;  %v1595_v18 = vld [vmem:[#allocation7 + $0x38] sm:$0xff]   ;;  %v1600_v23 = vld [vmem:[#allocation8 + $0x20] sm:$0xff]   ;;  %p1828_p12 = pnand %p1827_p6, %p2416_p9  ;;  %s1832_s24 = scalar_lea.vmem %s1831_s10, 256 }
  0xd5   : > { %1352 = vmatpush3.bf16.msra.mxu0 %v1581_v2  ;;  %1372 = vmatpush3.bf16.msra.mxu1 %v1589_v6  ;;  %v1598_v21 = vld [vmem:[#allocation8 + $0x10] sm:$0xff]   ;;  %v1599_v22 = vld [vmem:[#allocation8 + $0x18] sm:$0xff]   ;;  %v1601_v24 = vld [vmem:[#allocation8 + $0x28] sm:$0xff]   ;;  %p1833_p13 = scmp.lt.s32.totalorder %s2344_s21, %s1831_s10  ;;  %p1834_p0 = scmp.lt.s32.totalorder %s1832_s24, %s1826_s13 }
  0xd6   : > { %1353 = vmatprep.subr.bf16.mxu0 %v1915_v0  ;;  %1373 = vmatprep.subr.bf16.mxu1 %v1915_v0  ;;  %v1237_v25 = vld [vmem:[%s2393_s7] ss:$0 sm:$0xff]  ;;  %v1603_v34 = vld [vmem:[#allocation8 + $0x38] sm:$0xff]   ;;  %v1604_v35 = vld [vmem:[#allocation10] sm:$0xff]   ;;  %p1829_p1 = pneg %p1828_p12 }
  0xd7   : > { %v1602_v33 = vld [vmem:[#allocation8 + $0x30] sm:$0xff]   ;;  %v1605_v36 = vld [vmem:[#allocation10 + $0x8] sm:$0xff]   ;;  %v1607_v38 = vld [vmem:[#allocation10 + $0x18] sm:$0xff]   ;;  %p1835_p2 = por %p1834_p0, %p1833_p13 }
  0xd8   : > { %v1606_v37 = vld [vmem:[#allocation10 + $0x10] sm:$0xff]   ;;  %v1608_v39 = vld [vmem:[#allocation10 + $0x20] sm:$0xff]   ;;  %v1609_v40 = vld [vmem:[#allocation10 + $0x28] sm:$0xff]  }
  0xd9   : > { %1354 = vmatpush3.bf16.msra.mxu0 %v1582_v3  ;;  %1374 = vmatpush3.bf16.msra.mxu1 %v1590_v8  ;;  %v1246_v41 = vld [vmem:[%s2393_s7 + $0x1] ss:$0 sm:$0xff]  ;;  %v1611_v50 = vld [vmem:[#allocation10 + $0x38] sm:$0xff]   ;;  %v1612_v51 = vld [vmem:[#allocation11] sm:$0xff]   ;;  %p1836_p3 = pnand %p1835_p2, %p1829_p1 }
  0xda   : > { %1355 = vmatprep.subr.bf16.mxu0 %v1915_v0  ;;  %1375 = vmatprep.subr.bf16.mxu1 %v1915_v0  ;;  %v1610_v49 = vld [vmem:[#allocation10 + $0x30] sm:$0xff]   ;;  %v1613_v52 = vld [vmem:[#allocation11 + $0x8] sm:$0xff]   ;;  %v1615_v54 = vld [vmem:[#allocation11 + $0x18] sm:$0xff]  }
  0xdb   : > { %v1614_v53 = vld [vmem:[#allocation11 + $0x10] sm:$0xff]   ;;  %v1616_v55 = vld [vmem:[#allocation11 + $0x20] sm:$0xff]   ;;  %v1617_v56 = vld [vmem:[#allocation11 + $0x28] sm:$0xff]  }
  0xdc   : > { %v1255_v57 = vld [vmem:[%s2393_s7 + $0x2] ss:$0 sm:$0xff]  ;;  %v1619_v3 = vld [vmem:[#allocation11 + $0x38] sm:$0xff]   ;;  %v1620_v4 = vld [vmem:[#allocation13] sm:$0xff]  }
  0xdd   : > { %1356 = vmatpush3.bf16.msra.mxu0 %v1583_v5  ;;  %1376 = vmatpush3.bf16.msra.mxu1 %v1591_v10  ;;  %v1618_v2 = vld [vmem:[#allocation11 + $0x30] sm:$0xff]   ;;  %v1621_v5 = vld [vmem:[#allocation13 + $0x8] sm:$0xff]   ;;  %v1624_v8 = vld [vmem:[#allocation13 + $0x20] sm:$0xff]  }
  0xde   : > { %1357 = vmatprep.subr.bf16.mxu0 %v1915_v0  ;;  %1377 = vmatprep.subr.bf16.mxu1 %v1915_v0  ;;  %v1622_v6 = vld [vmem:[#allocation13 + $0x10] sm:$0xff]  }
  0xdf   : > { %v1264_v10 = vld [vmem:[%s2393_s7 + $0x3] ss:$0 sm:$0xff] }
  0xe1   : > { %1358 = vmatpush3.bf16.msra.mxu0 %v1584_v7  ;;  %1378 = vmatpush3.bf16.msra.mxu1 %v1592_v12  ;;  %v1623_v7 = vld [vmem:[#allocation13 + $0x18] sm:$0xff]  }
  0xe2   : > { %1359 = vmatprep.subr.bf16.mxu0 %v1915_v0  ;;  %1379 = vmatprep.subr.bf16.mxu1 %v1915_v0 }
  0xe5   : > { %1360 = vmatpush3.bf16.msra.mxu0 %v1585_v9  ;;  %1380 = vmatpush3.bf16.msra.mxu1 %v1593_v15  ;;  %v1625_v9 = vld [vmem:[#allocation13 + $0x28] sm:$0xff]  }
  0xe6   : > { %1361 = vmatprep.subr.bf16.mxu0 %v1915_v0  ;;  %1381 = vmatprep.subr.bf16.mxu1 %v1915_v0 }
  0xe9   : > { %1362 = vmatpush3.bf16.msra.mxu0 %v1586_v11  ;;  %1382 = vmatpush3.bf16.msra.mxu1 %v1594_v17 }
  0xea   : > { %1363 = vmatprep.subr.bf16.mxu0 %v1915_v0  ;;  %1383 = vmatprep.subr.bf16.mxu1 %v1915_v0 }
  0xed   : > { %1364 = vmatpush3.bf16.msra.mxu0 %v1587_v13  ;;  %1384 = vmatpush3.bf16.msra.mxu1 %v1595_v18  ;;  %v1626_v18 = vld [vmem:[#allocation13 + $0x30] sm:$0xff]  }
  0xee   : > { %1389 = vmatprep.subr.bf16.mxu0 %v1915_v0  ;;  %1409 = vmatprep.subr.bf16.mxu1 %v1915_v0 }
  0xf0   : > { %1366 = vmatmul.mubr.bf16.vlgmr.msra.gmra.mrb[0].mxu0 %v410_v16 }
  0xf1   : > { %1405 = vmatprep.mubr.msk.bf16.mxu0 %vm1916_vm0, %v1915_v0  ;;  %1390 = vmatpush3.bf16.msra.mxu0 %v1596_v19  ;;  %v1627_v19 = vld [vmem:[#allocation13 + $0x38] sm:$0xff]  }
  0xf2   : > { %1391 = vmatprep.subr.bf16.mxu0 %v1915_v0 }
  0xf5   : > { %1392 = vmatpush3.bf16.msra.mxu0 %v1597_v20  ;;  %v1273_v20 = vld [vmem:[%s2393_s7 + $0x4] ss:$0 sm:$0xff] }
  0xf6   : > { %1393 = vmatprep.subr.bf16.mxu0 %v1915_v0 }
  0xf9   : > { %1394 = vmatpush3.bf16.msra.mxu0 %v1598_v21 }
  0xfa   : > { %1395 = vmatprep.subr.bf16.mxu0 %v1915_v0 }
  0xfd   : > { %1396 = vmatpush3.bf16.msra.mxu0 %v1599_v22 }
  0xfe   : > { %1397 = vmatprep.subr.bf16.mxu0 %v1915_v0 }
 0x101   : > { %1398 = vmatpush3.bf16.msra.mxu0 %v1600_v23 }
 0x102   : > { %1399 = vmatprep.subr.bf16.mxu0 %v1915_v0 }
 0x105   : > { %1400 = vmatpush3.bf16.msra.mxu0 %v1601_v24 }
 0x106   : > { %1401 = vmatprep.subr.bf16.mxu0 %v1915_v0 }
 0x109   : > { %1402 = vmatpush3.bf16.msra.mxu0 %v1602_v33 }
 0x10a   : > { %1403 = vmatprep.subr.bf16.mxu0 %v1915_v0 }
 0x10d   : > { %1404 = vmatpush3.bf16.msra.mxu0 %v1603_v34 }
 0x10e   : > { %1429 = vmatprep.subr.bf16.mxu0 %v1915_v0 }
 0x1c3   : > { %v514_v26 = vpop.f32.mrb[0].mxu0 }
 0x1c4   : > { %v515_v27 = vadd.f32 %v1237_v25, %v514_v26  ;;  %v1367_v28 = vpop.f32.mrb[1].mxu0 }
 0x1c5   : > { %v517_v29 = vpop.f32.mrb[2].mxu0 }
 0x1c6   : > { %v520_v30 = vmax.f32 %v515_v27, 0.0  ;;  %v1368_v31 = vpop.f32.mrb[3].mxu0 }
 0x1c8   : > { %v521_v32 = vpack.c.bf16 %v520_v30, %v520_v30 }
 0x1ca   : > { %1386 = vmatmul.mubr.bf16.vlgmr.msra.gmra.mrb[0].mxu1 %v521_v32 }
 0x1cb   : > { %1425 = vmatprep.mubr.msk.bf16.mxu1 %vm1916_vm0, %v1915_v0  ;;  %1410 = vmatpush3.bf16.msra.mxu1 %v1604_v35 }
 0x1cc   : > { %1411 = vmatprep.subr.bf16.mxu1 %v1915_v0 }
 0x1cf   : > { %1412 = vmatpush3.bf16.msra.mxu1 %v1605_v36 }
 0x1d0   : > { %1413 = vmatprep.subr.bf16.mxu1 %v1915_v0 }
 0x1d3   : > { %1414 = vmatpush3.bf16.msra.mxu1 %v1606_v37 }
 0x1d4   : > { %1415 = vmatprep.subr.bf16.mxu1 %v1915_v0 }
 0x1d7   : > { %1416 = vmatpush3.bf16.msra.mxu1 %v1607_v38 }
 0x1d8   : > { %1417 = vmatprep.subr.bf16.mxu1 %v1915_v0 }
 0x1db   : > { %1418 = vmatpush3.bf16.msra.mxu1 %v1608_v39 }
 0x1dc   : > { %1419 = vmatprep.subr.bf16.mxu1 %v1915_v0 }
 0x1df   : > { %1420 = vmatpush3.bf16.msra.mxu1 %v1609_v40 }
 0x1e0   : > { %1421 = vmatprep.subr.bf16.mxu1 %v1915_v0 }
 0x1e3   : > { %1422 = vmatpush3.bf16.msra.mxu1 %v1610_v49 }
 0x1e4   : > { %1423 = vmatprep.subr.bf16.mxu1 %v1915_v0 }
 0x1e7   : > { %1424 = vmatpush3.bf16.msra.mxu1 %v1611_v50 }
 0x1e8   : > { %1449 = vmatprep.subr.bf16.mxu1 %v1915_v0 }
 0x29d   : > { %v625_v42 = vpop.f32.mrb[0].mxu1 }
 0x29e   : > { %v626_v43 = vadd.f32 %v1246_v41, %v625_v42  ;;  %v1387_v44 = vpop.f32.mrb[1].mxu1 }
 0x29f   : > { %v628_v45 = vpop.f32.mrb[2].mxu1 }
 0x2a0   : > { %v631_v46 = vmax.f32 %v626_v43, 0.0  ;;  %v1388_v47 = vpop.f32.mrb[3].mxu1 }
 0x2a2   : > { %v632_v48 = vpack.c.bf16 %v631_v46, %v631_v46 }
 0x2a4   : > { %1406 = vmatmul.mubr.bf16.vlgmr.msra.gmra.mrb[4].mxu0 %v632_v48 }
 0x2a5   : > { %1445 = vmatprep.mubr.msk.bf16.mxu0 %vm1916_vm0, %v1915_v0  ;;  %1430 = vmatpush3.bf16.msra.mxu0 %v1612_v51 }
 0x2a6   : > { %1431 = vmatprep.subr.bf16.mxu0 %v1915_v0 }
 0x2a9   : > { %1432 = vmatpush3.bf16.msra.mxu0 %v1613_v52 }
 0x2aa   : > { %1433 = vmatprep.subr.bf16.mxu0 %v1915_v0 }
 0x2ad   : > { %1434 = vmatpush3.bf16.msra.mxu0 %v1614_v53 }
 0x2ae   : > { %1435 = vmatprep.subr.bf16.mxu0 %v1915_v0 }
 0x2b1   : > { %1436 = vmatpush3.bf16.msra.mxu0 %v1615_v54 }
 0x2b2   : > { %1437 = vmatprep.subr.bf16.mxu0 %v1915_v0 }
 0x2b5   : > { %1438 = vmatpush3.bf16.msra.mxu0 %v1616_v55 }
 0x2b6   : > { %1439 = vmatprep.subr.bf16.mxu0 %v1915_v0 }
 0x2b9   : > { %1440 = vmatpush3.bf16.msra.mxu0 %v1617_v56 }
 0x2ba   : > { %1441 = vmatprep.subr.bf16.mxu0 %v1915_v0 }
 0x2bd   : > { %1442 = vmatpush3.bf16.msra.mxu0 %v1618_v2 }
 0x2be   : > { %1443 = vmatprep.subr.bf16.mxu0 %v1915_v0 }
 0x2c1   : > { %1444 = vmatpush3.bf16.msra.mxu0 %v1619_v3 }
 0x377   : > { %v736_v58 = vpop.f32.mrb[4].mxu0 }
 0x378   : > { %v737_v59 = vadd.f32 %v1255_v57, %v736_v58  ;;  %v1407_v60 = vpop.f32.mrb[5].mxu0 }
 0x379   : > { %v739_v61 = vpop.f32.mrb[6].mxu0 }
 0x37a   : > { %v742_v62 = vmax.f32 %v737_v59, 0.0  ;;  %v1408_v63 = vpop.f32.mrb[7].mxu0 }
 0x37c   : > { %v743_v1 = vpack.c.bf16 %v742_v62, %v742_v62 }
 0x37e   : > { %1426 = vmatmul.mubr.bf16.vlgmr.msra.gmra.mrb[4].mxu1 %v743_v1 }
 0x37f   : > { %1465 = vmatprep.mubr.msk.bf16.mxu1 %vm1916_vm0, %v1915_v0  ;;  %1450 = vmatpush3.bf16.msra.mxu1 %v1620_v4 }
 0x380   : > { %1451 = vmatprep.subr.bf16.mxu1 %v1915_v0 }
 0x383   : > { %1452 = vmatpush3.bf16.msra.mxu1 %v1621_v5 }
 0x384   : > { %1453 = vmatprep.subr.bf16.mxu1 %v1915_v0 }
 0x387   : > { %1454 = vmatpush3.bf16.msra.mxu1 %v1622_v6 }
 0x388   : > { %1455 = vmatprep.subr.bf16.mxu1 %v1915_v0 }
 0x38b   : > { %1456 = vmatpush3.bf16.msra.mxu1 %v1623_v7 }
 0x38c   : > { %1457 = vmatprep.subr.bf16.mxu1 %v1915_v0 }
 0x38f   : > { %1458 = vmatpush3.bf16.msra.mxu1 %v1624_v8 }
 0x390   : > { %1459 = vmatprep.subr.bf16.mxu1 %v1915_v0 }
 0x393   : > { %1460 = vmatpush3.bf16.msra.mxu1 %v1625_v9 }
 0x394   : > { %1461 = vmatprep.subr.bf16.mxu1 %v1915_v0 }
 0x397   : > { %1462 = vmatpush3.bf16.msra.mxu1 %v1626_v18 }
 0x398   : > { %1463 = vmatprep.subr.bf16.mxu1 %v1915_v0  ;;  %v1282_v0 = vld [vmem:[%s2393_s7 + $0x5] ss:$0 sm:$0xff] }
 0x39b   : > { %1464 = vmatpush3.bf16.msra.mxu1 %v1627_v19 }
 0x451   : > { %v847_v11 = vpop.f32.mrb[4].mxu1 }
 0x452   : > { %v848_v12 = vadd.f32 %v1264_v10, %v847_v11  ;;  %v1427_v13 = vpop.f32.mrb[5].mxu1 }
 0x453   : > { %v850_v14 = vpop.f32.mrb[6].mxu1 }
 0x454   : > { %v853_v15 = vmax.f32 %v848_v12, 0.0  ;;  %v1428_v16 = vpop.f32.mrb[7].mxu1 }
 0x456   : > { %v854_v17 = vpack.c.bf16 %v853_v15, %v853_v15 }
 0x458   : > { %1446 = vmatmul.mubr.bf16.vlgmr.msra.gmra.mrb[8].mxu0 %v854_v17 }
 0x52b   : > { %v958_v21 = vpop.f32.mrb[8].mxu0 }
 0x52c   : > { %v959_v22 = vadd.f32 %v1273_v20, %v958_v21  ;;  %v1447_v23 = vpop.f32.mrb[9].mxu0 }
 0x52d   : > { %v961_v24 = vpop.f32.mrb[10].mxu0 }
 0x52e   : > { %v964_v25 = vmax.f32 %v959_v22, 0.0  ;;  %v1448_v26 = vpop.f32.mrb[11].mxu0 }
 0x530   : > { %v965_v27 = vpack.c.bf16 %v964_v25, %v964_v25 }
 0x532   : > { %1466 = vmatmul.mubr.bf16.vlgmr.msra.gmra.mrb[8].mxu1 %v965_v27 }
 0x605   : > { %v1069_v28 = vpop.f32.mrb[8].mxu1 }
 0x606   : > { %v1070_v29 = vadd.f32 %v1282_v0, %v1069_v28  ;;  %v1467_v30 = vpop.f32.mrb[9].mxu1 }
 0x607   : > { %v1072_v31 = vpop.f32.mrb[10].mxu1 }
 0x608   : > { %1075 = vst [vmem:[%s407_s9] sm:$0xff] %v1070_v29  ;;  %v1468_v32 = vpop.f32.mrb[11].mxu1 }
 0x609   : > { %1839 = shalt.err (!%p1836_p3)
}
 0x60a   : > { %s1840_s1 = scalar_lea.hbm %s2342_s17, 128  ;;  %s1844_s14 = scalar_lea.hbm %s2394_s8, 256 }
 0x60b   : > { %p1841_p4 = scmp.ne.s32.totalorder %s2342_s17, %s1840_s1  ;;  %p1845_p8 = scmp.lt.u32.totalorder %s2342_s17, %s2394_s8 }
 0x60c   : > { %p1846_p5 = scmp.lt.u32.totalorder %s1844_s14, %s1840_s1  ;;  %p1848_p6 = scmp.lt.u32.totalorder %s1840_s1, %s2342_s17 }
 0x60d   : > { %p1842_p10 = pnand %p1841_p4, %p2416_p9 }
 0x60e   : > { %p1847_p7 = por %p1846_p5, %p1845_p8 }
 0x60f   : > { %p1843_p11 = pneg %p1842_p10 }
 0x610   : > { %p1849_p12 = por %p1848_p6, %p1847_p7 }
 0x612   : > { %p1850_p1 = pnand %p1849_p12, %p1843_p11 }
 0x614   : > { %1853 = shalt.err (!%p1850_p1)
}
 0x615   : > { %1495 = dma.vmem_to_hbm [thread:$0]  (%p2416_p9), %s2344_s21, 128, %s2342_s17, %s1077_s11  }
 0x616 PF: > { %s1102_s19 = sand.u32 1, %s1892_s27   ;;  %p2417_p13 = scmp.ne.s32.totalorder %s2407_s22, 0 }
 0x617   : > { %p2418_p0 = scmp.ge.s32.totalorder %s1904_s30, 2  ;;  %s1103_s15 = scalar_lea.sflag [#allocation4], %s1102_s19 }
 0x619   : > { %p1521_p2 = pnand %p2418_p0, %p2417_p13 }
 0x61b   : > { %1887 = dma.done.wait (!%p1521_p2), %s1103_s15, 128  }
 0x61c   : > { %1889 = vsyncadd (!%p1521_p2), %s1103_s15, 4294967168  ;;  %p24_p3 = scmp.ge.s32.totalorder %s2157_s23, 4   ;;  %s2419_s27 = smov %s1896_s28 }
 0x61d   : > { %s2420_s28 = smov %s1900_s29  ;;  %s2421_s29 = smov %s2168_s18 }
 0x61e   : > { %s2422_s30 = smov %s2157_s23  ;;  %26 = sbr.rel (!%p24_p3) target bundleno = 10 (0xa), region = 121 }
 0x625   :  { %1108 = vsyncpa [#allocation3], 1 }
 0x626   :  { %1110 = vsyncpa [#allocation3 + $0x1], 1 }
 0x627   :  { %1111 = vsyncpa [#allocation6], 1 }
 0x628   :  { %1112 = vsyncpa [#allocation9], 1 }
 0x629   :  { %1113 = vsyncpa [#allocation12], 1 }
 0x62a   :  { %1114 = vsyncpa [#allocation4], 1 }
 0x62b   :  { %1116 = vsyncpa [#allocation4 + $0x1], 1 }

</bundles_post_ra>
